<compile_context>
chip_gen: v7x
topology: tpu7x:2x2x1
jax: 0.10.0
libtpu: 0.0.40
codegen_flags: <defaults>
</compile_context>

<pallas_src>
import jax
import jax.numpy as jnp
import numpy as np
from jax.experimental import pallas as pl
from jax.experimental.pallas import tpu as pltpu


def _sum_bc(x):
    """Sum over the two leading (batch / channel) axes, keeping the lane axis."""
    return jnp.sum(jnp.sum(x, axis=0), axis=0)


def _det_loss_kernel(phm_ref, hm_ref, psz_ref, sz_ref, pori_ref, ori_ref,
                     out_ref, acc_ref):
    step = pl.program_id(0)

    @pl.when(step == 0)
    def _init():
        acc_ref[...] = jnp.zeros_like(acc_ref)

    # ---- heatmap branch -------------------------------------------------
    phm = phm_ref[...].astype(jnp.float32)   # (B, C_hm, T) pred logits
    hm = hm_ref[...].astype(jnp.float32)     # (B, C_hm, T) targets in [0, 1]

    # p_det = sigmoid(phm * (1 - 2*hm)), via tanh -> single EUP transcendental.
    z = phm * (1.0 - 2.0 * hm)
    p_det = 0.5 * (jnp.tanh(0.5 * z) + 1.0)

    # Stable BCE-with-logits: max(x,0) - x*y + log1p(exp(-|x|))
    bce = jnp.maximum(phm, 0.0) - phm * hm + jnp.log1p(jnp.exp(-jnp.abs(phm)))

    # size_w = max over channel axis, shape (B, 1, T)
    size_w = jnp.max(hm, axis=1, keepdims=True)

    # ---- regression branches --------------------------------------------
    psz = psz_ref[...].astype(jnp.float32)   # (B, C_sz, T)
    sz = sz_ref[...].astype(jnp.float32)
    pori = pori_ref[...].astype(jnp.float32) # (B, C_or, T)
    ori = ori_ref[...].astype(jnp.float32)

    def smooth_l1(pred, tgt):
        d = pred - tgt
        ad = jnp.abs(d)
        return jnp.where(ad < 1.0, 0.5 * d * d, ad - 0.5)

    # Sum SmoothL1 over C first so size_w multiplies a (B, 1, T) slab.
    l_box = jnp.sum(smooth_l1(psz, sz), axis=1, keepdims=True)
    l_ori = jnp.sum(smooth_l1(pori, ori), axis=1, keepdims=True)

    # ---- accumulate lane-shaped partial sums ------------------------------
    acc_ref[0, :] += _sum_bc(bce * p_det)
    acc_ref[1, :] += _sum_bc(p_det)
    acc_ref[2, :] += _sum_bc(size_w)
    acc_ref[3, :] += _sum_bc(size_w * l_box)
    acc_ref[4, :] += _sum_bc(size_w * l_ori)

    # ---- finalize on the last grid step -----------------------------------
    @pl.when(step == pl.num_programs(0) - 1)
    def _finalize():
        s_num = jnp.sum(acc_ref[0, :])   # sum(bce * p_det)
        s_p = jnp.sum(acc_ref[1, :])     # sum(p_det)
        s_w = jnp.sum(acc_ref[2, :])     # sum(size_w)
        s_box = jnp.sum(acc_ref[3, :])   # sum(size_w * L_box)
        s_ori = jnp.sum(acc_ref[4, :])   # sum(size_w * L_ori)

        c_sz = psz_ref.shape[1]
        c_or = pori_ref.shape[1]
        # mean-ratios rewritten as sum-ratios (same element-count algebra as
        # the PyTorch module; the 1/C factor comes from the numerator's mean
        # being over C_x*B*HW elements vs the denominator's B*HW).
        out_ref[0] = s_num / s_p
        out_ref[1] = s_box / (float(c_sz) * s_w)
        out_ref[2] = s_ori / (float(c_or) * s_w)


def _pick_tile_hw(hw, requested=None):
    """Largest multiple-of-128 divisor of hw that is <= 2048 (VMEM-safe on
    v5e/v6e/v7x with 6 double-buffered inputs); fall back to the full extent
    if hw is not a multiple of 128."""
    if requested is not None:
        assert hw % requested == 0, "tile_hw must divide H*W"
        assert requested % 128 == 0 or requested == hw, \
            "tile_hw must be a multiple of 128 (or the full extent)"
        return requested
    if hw % 128 != 0:
        return hw
    best = 128
    t = 128
    cap = min(hw, 2048)
    while t <= cap:
        if hw % t == 0:
            best = t
        t += 128
    return best


def det_loss_pallas(pred_heatmaps, heatmaps, pred_sizemaps, sizemaps,
                    pred_orimaps, orimaps, *, tile_hw=None):
    """Returns (det_loss, box_loss, ori_loss) matching DetLoss.forward.

    Inputs may be f32 or bf16; accumulation is always f32 in-kernel.
    """
    B, Chm, H, W = pred_heatmaps.shape
    Csz = pred_sizemaps.shape[1]
    Cor = pred_orimaps.shape[1]
    hw = H * W

    T = _pick_tile_hw(hw, tile_hw)
    n_steps = hw // T

    args = (
        pred_heatmaps.reshape(B, Chm, hw),
        heatmaps.reshape(B, Chm, hw),
        pred_sizemaps.reshape(B, Csz, hw),
        sizemaps.reshape(B, Csz, hw),
        pred_orimaps.reshape(B, Cor, hw),
        orimaps.reshape(B, Cor, hw),
    )

    def spec(c):
        # Stream a (B, C, T) lane-tile per grid step; C equals the full
        # channel extent so the (8, 128) tiling constraint is satisfied.
        return pl.BlockSpec((B, c, T), lambda i: (0, 0, i))

    n_hm = B * Chm * hw
    n_reg = B * (Csz + Cor) * hw
    bytes_accessed = sum(int(a.size) * a.dtype.itemsize for a in args) + 3 * 4
    cost = pl.CostEstimate(
        flops=int(16 * n_hm + 9 * n_reg),
        transcendentals=int(3 * n_hm),   # tanh + exp + log1p per heatmap elem
        bytes_accessed=int(bytes_accessed),
    )

    out = pl.pallas_call(
        _det_loss_kernel,
        out_shape=jax.ShapeDtypeStruct((3,), jnp.float32),
        grid=(n_steps,),
        in_specs=[spec(Chm), spec(Chm), spec(Csz), spec(Csz),
                  spec(Cor), spec(Cor)],
        out_specs=pl.BlockSpec(memory_space=pltpu.MemorySpace.SMEM),
        scratch_shapes=[pltpu.VMEM((5, T), jnp.float32)],
        compiler_params=pltpu.CompilerParams(
            dimension_semantics=("arbitrary",),
            vmem_limit_bytes=32 * 1024 * 1024,
        ),
        cost_estimate=cost,
    )(*args)
    return out[0], out[1], out[2]


def det_loss_ref(pred_hm, hm, pred_sz, sz, pred_ori, ori):
    """Pure-JAX reference mirroring the PyTorch module exactly."""
    size_w = jnp.max(hm, axis=1, keepdims=True)
    p_det = jax.nn.sigmoid(pred_hm * (1.0 - 2.0 * hm))
    bce = (jnp.maximum(pred_hm, 0.0) - pred_hm * hm
           + jnp.log1p(jnp.exp(-jnp.abs(pred_hm))))

    def smooth_l1(a, b):
        d = a - b
        ad = jnp.abs(d)
        return jnp.where(ad < 1.0, 0.5 * d * d, ad - 0.5)

    det = jnp.mean(bce * p_det) / jnp.mean(p_det)
    box = jnp.mean(size_w * smooth_l1(pred_sz, sz)) / jnp.mean(size_w)
    orl = jnp.mean(size_w * smooth_l1(pred_ori, ori)) / jnp.mean(size_w)
    return det, box, orl


if __name__ == "__main__":
    key = jax.random.PRNGKey(0)
    k1, k2, k3, k4, k5, k6 = jax.random.split(key, 6)

    B, C_HM, C_SZ, C_OR, H, W = 2, 4, 2, 2, 16, 16

    # Predicted logits / regressions ~ N(0,1); target heatmaps in [0, 1].
    pred_heatmaps = jax.random.normal(k1, (B, C_HM, H, W), jnp.float32)
    heatmaps = jax.nn.sigmoid(2.0 * jax.random.normal(k2, (B, C_HM, H, W), jnp.float32))
    pred_sizemaps = jax.random.normal(k3, (B, C_SZ, H, W), jnp.float32)
    sizemaps = jax.random.normal(k4, (B, C_SZ, H, W), jnp.float32) * 2.0
    pred_orimaps = jax.random.normal(k5, (B, C_OR, H, W), jnp.float32)
    orimaps = jax.random.normal(k6, (B, C_OR, H, W), jnp.float32)

    # tile_hw=128 -> 2 grid steps, exercising the init / accumulate / finalize
    # path of the pipelined reduction even at these tiny test shapes.
    det, box, orl = det_loss_pallas(pred_heatmaps, heatmaps, pred_sizemaps,
                                    sizemaps, pred_orimaps, orimaps,
                                    tile_hw=128)
    jax.block_until_ready((det, box, orl))

    det_r, box_r, orl_r = det_loss_ref(pred_heatmaps, heatmaps, pred_sizemaps,
                                       sizemaps, pred_orimaps, orimaps)
    np.testing.assert_allclose(np.array(det), np.array(det_r), rtol=2e-4, atol=2e-5)
    np.testing.assert_allclose(np.array(box), np.array(box_r), rtol=2e-4, atol=2e-5)
    np.testing.assert_allclose(np.array(orl), np.array(orl_r), rtol=2e-4, atol=2e-5)

    print("KERNEL_OK")
</pallas_src>

<mosaic_0001>
module attributes {stable_mosaic.version = 11 : i64} {
  func.func @_det_loss_kernel(%arg0: i32, %arg1: memref<2x4x128xf32, #tpu.memory_space<vmem>>, %arg2: memref<2x4x128xf32, #tpu.memory_space<vmem>>, %arg3: memref<2x2x128xf32, #tpu.memory_space<vmem>>, %arg4: memref<2x2x128xf32, #tpu.memory_space<vmem>>, %arg5: memref<2x2x128xf32, #tpu.memory_space<vmem>>, %arg6: memref<2x2x128xf32, #tpu.memory_space<vmem>>, %arg7: memref<3xf32, #tpu.memory_space<smem>>, %arg8: memref<5x128xf32, #tpu.memory_space<vmem>>) attributes {dimension_semantics = [#tpu.dimension_semantics<arbitrary>], iteration_bounds = array<i64: 2>, scalar_prefetch = 0 : i64, scratch_operands = 1 : i64, tpu.core_type = #tpu.core_type<tc>, window_params = [{transform_indices = @transform_0, window_bounds = array<i64: 2, 4, 128>}, {transform_indices = @transform_1, window_bounds = array<i64: 2, 4, 128>}, {transform_indices = @transform_2, window_bounds = array<i64: 2, 2, 128>}, {transform_indices = @transform_3, window_bounds = array<i64: 2, 2, 128>}, {transform_indices = @transform_4, window_bounds = array<i64: 2, 2, 128>}, {transform_indices = @transform_5, window_bounds = array<i64: 2, 2, 128>}, {transform_indices = @transform_6, window_bounds = array<i64: 3>}]} {
    %c0_i32 = arith.constant 0 : i32
    %0 = arith.cmpi eq, %arg0, %c0_i32 : i32
    %1 = arith.extui %0 : i1 to i32
    %c0_i32_0 = arith.constant 0 : i32
    %2 = arith.cmpi ne, %1, %c0_i32_0 : i32
    scf.if %2 {
      %cst_60 = arith.constant 0.000000e+00 : f32
      %103 = vector.broadcast %cst_60 : f32 to vector<5x128xf32>
      %c0_61 = arith.constant 0 : index
      %c0_62 = arith.constant 0 : index
      %104 = vector.load %arg8[%c0_61, %c0_62] : memref<5x128xf32, #tpu.memory_space<vmem>>, vector<5x128xf32>
      tpu.vector_store %arg8[%c0_61, %c0_62], %103 {strides = array<i32>} : memref<5x128xf32, #tpu.memory_space<vmem>>, vector<5x128xf32>,
    } else {
    }
    %c0 = arith.constant 0 : index
    %c0_1 = arith.constant 0 : index
    %c0_2 = arith.constant 0 : index
    %3 = vector.load %arg1[%c0, %c0_1, %c0_2] : memref<2x4x128xf32, #tpu.memory_space<vmem>>, vector<2x4x128xf32>
    %c0_3 = arith.constant 0 : index
    %c0_4 = arith.constant 0 : index
    %c0_5 = arith.constant 0 : index
    %4 = vector.load %arg2[%c0_3, %c0_4, %c0_5] : memref<2x4x128xf32, #tpu.memory_space<vmem>>, vector<2x4x128xf32>
    %cst = arith.constant 2.000000e+00 : f32
    %5 = vector.broadcast %cst : f32 to vector<2x4x128xf32>
    %6 = arith.mulf %5, %4 : vector<2x4x128xf32>
    %cst_6 = arith.constant 1.000000e+00 : f32
    %7 = vector.broadcast %cst_6 : f32 to vector<2x4x128xf32>
    %8 = arith.subf %7, %6 : vector<2x4x128xf32>
    %9 = arith.mulf %3, %8 : vector<2x4x128xf32>
    %cst_7 = arith.constant 5.000000e-01 : f32
    %10 = vector.broadcast %cst_7 : f32 to vector<2x4x128xf32>
    %11 = arith.mulf %10, %9 : vector<2x4x128xf32>
    %12 = math.tanh %11 : vector<2x4x128xf32>
    %cst_8 = arith.constant 1.000000e+00 : f32
    %13 = vector.broadcast %cst_8 : f32 to vector<2x4x128xf32>
    %14 = arith.addf %12, %13 : vector<2x4x128xf32>
    %cst_9 = arith.constant 5.000000e-01 : f32
    %15 = vector.broadcast %cst_9 : f32 to vector<2x4x128xf32>
    %16 = arith.mulf %15, %14 : vector<2x4x128xf32>
    %cst_10 = arith.constant 0.000000e+00 : f32
    %17 = vector.broadcast %cst_10 : f32 to vector<2x4x128xf32>
    %18 = arith.maximumf %3, %17 : vector<2x4x128xf32>
    %19 = arith.mulf %3, %4 : vector<2x4x128xf32>
    %20 = arith.subf %18, %19 : vector<2x4x128xf32>
    %21 = math.absf %3 : vector<2x4x128xf32>
    %cst_11 = arith.constant 0.000000e+00 : f32
    %22 = vector.broadcast %cst_11 : f32 to vector<2x4x128xf32>
    %23 = arith.subf %22, %21 : vector<2x4x128xf32>
    %24 = math.exp %23 : vector<2x4x128xf32>
    %25 = math.log1p %24 : vector<2x4x128xf32>
    %26 = arith.addf %20, %25 : vector<2x4x128xf32>
    %cst_12 = arith.constant dense<0xFF800000> : vector<2x128xf32>
    %27 = vector.multi_reduction <maximumf>, %4, %cst_12 [1] : vector<2x4x128xf32> to vector<2x128xf32>
    %28 = vector.shape_cast %27 : vector<2x128xf32> to vector<2x1x128xf32>
    %c0_13 = arith.constant 0 : index
    %c0_14 = arith.constant 0 : index
    %c0_15 = arith.constant 0 : index
    %29 = vector.load %arg3[%c0_13, %c0_14, %c0_15] : memref<2x2x128xf32, #tpu.memory_space<vmem>>, vector<2x2x128xf32>
    %c0_16 = arith.constant 0 : index
    %c0_17 = arith.constant 0 : index
    %c0_18 = arith.constant 0 : index
    %30 = vector.load %arg4[%c0_16, %c0_17, %c0_18] : memref<2x2x128xf32, #tpu.memory_space<vmem>>, vector<2x2x128xf32>
    %c0_19 = arith.constant 0 : index
    %c0_20 = arith.constant 0 : index
    %c0_21 = arith.constant 0 : index
    %31 = vector.load %arg5[%c0_19, %c0_20, %c0_21] : memref<2x2x128xf32, #tpu.memory_space<vmem>>, vector<2x2x128xf32>
    %c0_22 = arith.constant 0 : index
    %c0_23 = arith.constant 0 : index
    %c0_24 = arith.constant 0 : index
    %32 = vector.load %arg6[%c0_22, %c0_23, %c0_24] : memref<2x2x128xf32, #tpu.memory_space<vmem>>, vector<2x2x128xf32>
    %33 = arith.subf %29, %30 : vector<2x2x128xf32>
    %34 = math.absf %33 : vector<2x2x128xf32>
    %cst_25 = arith.constant 1.000000e+00 : f32
    %35 = vector.broadcast %cst_25 : f32 to vector<2x2x128xf32>
    %36 = arith.cmpf olt, %34, %35 : vector<2x2x128xf32>
    %cst_26 = arith.constant 5.000000e-01 : f32
    %37 = vector.broadcast %cst_26 : f32 to vector<2x2x128xf32>
    %38 = arith.mulf %37, %33 : vector<2x2x128xf32>
    %39 = arith.mulf %38, %33 : vector<2x2x128xf32>
    %cst_27 = arith.constant 5.000000e-01 : f32
    %40 = vector.broadcast %cst_27 : f32 to vector<2x2x128xf32>
    %41 = arith.subf %34, %40 : vector<2x2x128xf32>
    %42 = arith.select %36, %39, %41 : vector<2x2x128xi1>, vector<2x2x128xf32>
    %cst_28 = arith.constant dense<0.000000e+00> : vector<2x128xf32>
    %43 = vector.multi_reduction <add>, %42, %cst_28 [1] : vector<2x2x128xf32> to vector<2x128xf32>
    %44 = vector.shape_cast %43 : vector<2x128xf32> to vector<2x1x128xf32>
    %45 = arith.subf %31, %32 : vector<2x2x128xf32>
    %46 = math.absf %45 : vector<2x2x128xf32>
    %cst_29 = arith.constant 1.000000e+00 : f32
    %47 = vector.broadcast %cst_29 : f32 to vector<2x2x128xf32>
    %48 = arith.cmpf olt, %46, %47 : vector<2x2x128xf32>
    %cst_30 = arith.constant 5.000000e-01 : f32
    %49 = vector.broadcast %cst_30 : f32 to vector<2x2x128xf32>
    %50 = arith.mulf %49, %45 : vector<2x2x128xf32>
    %51 = arith.mulf %50, %45 : vector<2x2x128xf32>
    %cst_31 = arith.constant 5.000000e-01 : f32
    %52 = vector.broadcast %cst_31 : f32 to vector<2x2x128xf32>
    %53 = arith.subf %46, %52 : vector<2x2x128xf32>
    %54 = arith.select %48, %51, %53 : vector<2x2x128xi1>, vector<2x2x128xf32>
    %cst_32 = arith.constant dense<0.000000e+00> : vector<2x128xf32>
    %55 = vector.multi_reduction <add>, %54, %cst_32 [1] : vector<2x2x128xf32> to vector<2x128xf32>
    %56 = vector.shape_cast %55 : vector<2x128xf32> to vector<2x1x128xf32>
    %c0_33 = arith.constant 0 : index
    %c0_34 = arith.constant 0 : index
    %57 = vector.load %arg8[%c0_33, %c0_34] : memref<5x128xf32, #tpu.memory_space<vmem>>, vector<1x128xf32>
    %58 = vector.shape_cast %57 : vector<1x128xf32> to vector<128xf32>
    %59 = arith.mulf %26, %16 : vector<2x4x128xf32>
    %cst_35 = arith.constant dense<0.000000e+00> : vector<4x128xf32>
    %60 = vector.multi_reduction <add>, %59, %cst_35 [0] : vector<2x4x128xf32> to vector<4x128xf32>
    %cst_36 = arith.constant dense<0.000000e+00> : vector<128xf32>
    %61 = vector.multi_reduction <add>, %60, %cst_36 [0] : vector<4x128xf32> to vector<128xf32>
    %62 = arith.addf %58, %61 : vector<128xf32>
    %c0_37 = arith.constant 0 : index
    %c0_38 = arith.constant 0 : index
    %63 = vector.load %arg8[%c0_37, %c0_38] : memref<5x128xf32, #tpu.memory_space<vmem>>, vector<1x128xf32>
    %64 = vector.shape_cast %63 : vector<1x128xf32> to vector<128xf32>
    %65 = vector.shape_cast %62 : vector<128xf32> to vector<1x128xf32>
    tpu.vector_store %arg8[%c0_37, %c0_38], %65 {strides = array<i32>} : memref<5x128xf32, #tpu.memory_space<vmem>>, vector<1x128xf32>,
    %c1 = arith.constant 1 : index
    %c0_39 = arith.constant 0 : index
    %66 = vector.load %arg8[%c1, %c0_39] : memref<5x128xf32, #tpu.memory_space<vmem>>, vector<1x128xf32>
    %67 = vector.shape_cast %66 : vector<1x128xf32> to vector<128xf32>
    %cst_40 = arith.constant dense<0.000000e+00> : vector<4x128xf32>
    %68 = vector.multi_reduction <add>, %16, %cst_40 [0] : vector<2x4x128xf32> to vector<4x128xf32>
    %cst_41 = arith.constant dense<0.000000e+00> : vector<128xf32>
    %69 = vector.multi_reduction <add>, %68, %cst_41 [0] : vector<4x128xf32> to vector<128xf32>
    %70 = arith.addf %67, %69 : vector<128xf32>
    %c1_42 = arith.constant 1 : index
    %c0_43 = arith.constant 0 : index
    %71 = vector.load %arg8[%c1_42, %c0_43] : memref<5x128xf32, #tpu.memory_space<vmem>>, vector<1x128xf32>
    %72 = vector.shape_cast %71 : vector<1x128xf32> to vector<128xf32>
    %73 = vector.shape_cast %70 : vector<128xf32> to vector<1x128xf32>
    tpu.vector_store %arg8[%c1_42, %c0_43], %73 {strides = array<i32>} : memref<5x128xf32, #tpu.memory_space<vmem>>, vector<1x128xf32>,
    %c2 = arith.constant 2 : index
    %c0_44 = arith.constant 0 : index
    %74 = vector.load %arg8[%c2, %c0_44] : memref<5x128xf32, #tpu.memory_space<vmem>>, vector<1x128xf32>
    %75 = vector.shape_cast %74 : vector<1x128xf32> to vector<128xf32>
    %cst_45 = arith.constant dense<0.000000e+00> : vector<1x128xf32>
    %76 = vector.multi_reduction <add>, %28, %cst_45 [0] : vector<2x1x128xf32> to vector<1x128xf32>
    %cst_46 = arith.constant dense<0.000000e+00> : vector<128xf32>
    %77 = vector.multi_reduction <add>, %76, %cst_46 [0] : vector<1x128xf32> to vector<128xf32>
    %78 = arith.addf %75, %77 : vector<128xf32>
    %c2_47 = arith.constant 2 : index
    %c0_48 = arith.constant 0 : index
    %79 = vector.load %arg8[%c2_47, %c0_48] : memref<5x128xf32, #tpu.memory_space<vmem>>, vector<1x128xf32>
    %80 = vector.shape_cast %79 : vector<1x128xf32> to vector<128xf32>
    %81 = vector.shape_cast %78 : vector<128xf32> to vector<1x128xf32>
    tpu.vector_store %arg8[%c2_47, %c0_48], %81 {strides = array<i32>} : memref<5x128xf32, #tpu.memory_space<vmem>>, vector<1x128xf32>,
    %c3 = arith.constant 3 : index
    %c0_49 = arith.constant 0 : index
    %82 = vector.load %arg8[%c3, %c0_49] : memref<5x128xf32, #tpu.memory_space<vmem>>, vector<1x128xf32>
    %83 = vector.shape_cast %82 : vector<1x128xf32> to vector<128xf32>
    %84 = arith.mulf %28, %44 : vector<2x1x128xf32>
    %cst_50 = arith.constant dense<0.000000e+00> : vector<1x128xf32>
    %85 = vector.multi_reduction <add>, %84, %cst_50 [0] : vector<2x1x128xf32> to vector<1x128xf32>
    %cst_51 = arith.constant dense<0.000000e+00> : vector<128xf32>
    %86 = vector.multi_reduction <add>, %85, %cst_51 [0] : vector<1x128xf32> to vector<128xf32>
    %87 = arith.addf %83, %86 : vector<128xf32>
    %c3_52 = arith.constant 3 : index
    %c0_53 = arith.constant 0 : index
    %88 = vector.load %arg8[%c3_52, %c0_53] : memref<5x128xf32, #tpu.memory_space<vmem>>, vector<1x128xf32>
    %89 = vector.shape_cast %88 : vector<1x128xf32> to vector<128xf32>
    %90 = vector.shape_cast %87 : vector<128xf32> to vector<1x128xf32>
    tpu.vector_store %arg8[%c3_52, %c0_53], %90 {strides = array<i32>} : memref<5x128xf32, #tpu.memory_space<vmem>>, vector<1x128xf32>,
    %c4 = arith.constant 4 : index
    %c0_54 = arith.constant 0 : index
    %91 = vector.load %arg8[%c4, %c0_54] : memref<5x128xf32, #tpu.memory_space<vmem>>, vector<1x128xf32>
    %92 = vector.shape_cast %91 : vector<1x128xf32> to vector<128xf32>
    %93 = arith.mulf %28, %56 : vector<2x1x128xf32>
    %cst_55 = arith.constant dense<0.000000e+00> : vector<1x128xf32>
    %94 = vector.multi_reduction <add>, %93, %cst_55 [0] : vector<2x1x128xf32> to vector<1x128xf32>
    %cst_56 = arith.constant dense<0.000000e+00> : vector<128xf32>
    %95 = vector.multi_reduction <add>, %94, %cst_56 [0] : vector<1x128xf32> to vector<128xf32>
    %96 = arith.addf %92, %95 : vector<128xf32>
    %c4_57 = arith.constant 4 : index
    %c0_58 = arith.constant 0 : index
    %97 = vector.load %arg8[%c4_57, %c0_58] : memref<5x128xf32, #tpu.memory_space<vmem>>, vector<1x128xf32>
    %98 = vector.shape_cast %97 : vector<1x128xf32> to vector<128xf32>
    %99 = vector.shape_cast %96 : vector<128xf32> to vector<1x128xf32>
    tpu.vector_store %arg8[%c4_57, %c0_58], %99 {strides = array<i32>} : memref<5x128xf32, #tpu.memory_space<vmem>>, vector<1x128xf32>,
    %c1_i32 = arith.constant 1 : i32
    %100 = arith.cmpi eq, %arg0, %c1_i32 : i32
    %101 = arith.extui %100 : i1 to i32
    %c0_i32_59 = arith.constant 0 : i32
    %102 = arith.cmpi ne, %101, %c0_i32_59 : i32
    scf.if %102 {
      %c0_60 = arith.constant 0 : index
      %c0_61 = arith.constant 0 : index
      %103 = vector.load %arg8[%c0_60, %c0_61] : memref<5x128xf32, #tpu.memory_space<vmem>>, vector<1x128xf32>
      %104 = vector.shape_cast %103 : vector<1x128xf32> to vector<128xf32>
      %105 = vector.shape_cast %104 : vector<128xf32> to vector<1x128xf32>
      %cst_62 = arith.constant dense<0.000000e+00> : vector<1xf32>
      %106 = vector.multi_reduction <add>, %105, %cst_62 [1] : vector<1x128xf32> to vector<1xf32>
      %107 = vector.shape_cast %106 : vector<1xf32> to vector<1x1xf32>
      %108 = vector.extract %107[0, 0] : f32 from vector<1x1xf32>
      %c1_63 = arith.constant 1 : index
      %c0_64 = arith.constant 0 : index
      %109 = vector.load %arg8[%c1_63, %c0_64] : memref<5x128xf32, #tpu.memory_space<vmem>>, vector<1x128xf32>
      %110 = vector.shape_cast %109 : vector<1x128xf32> to vector<128xf32>
      %111 = vector.shape_cast %110 : vector<128xf32> to vector<1x128xf32>
      %cst_65 = arith.constant dense<0.000000e+00> : vector<1xf32>
      %112 = vector.multi_reduction <add>, %111, %cst_65 [1] : vector<1x128xf32> to vector<1xf32>
      %113 = vector.shape_cast %112 : vector<1xf32> to vector<1x1xf32>
      %114 = vector.extract %113[0, 0] : f32 from vector<1x1xf32>
      %c2_66 = arith.constant 2 : index
      %c0_67 = arith.constant 0 : index
      %115 = vector.load %arg8[%c2_66, %c0_67] : memref<5x128xf32, #tpu.memory_space<vmem>>, vector<1x128xf32>
      %116 = vector.shape_cast %115 : vector<1x128xf32> to vector<128xf32>
      %117 = vector.shape_cast %116 : vector<128xf32> to vector<1x128xf32>
      %cst_68 = arith.constant dense<0.000000e+00> : vector<1xf32>
      %118 = vector.multi_reduction <add>, %117, %cst_68 [1] : vector<1x128xf32> to vector<1xf32>
      %119 = vector.shape_cast %118 : vector<1xf32> to vector<1x1xf32>
      %120 = vector.extract %119[0, 0] : f32 from vector<1x1xf32>
      %c3_69 = arith.constant 3 : index
      %c0_70 = arith.constant 0 : index
      %121 = vector.load %arg8[%c3_69, %c0_70] : memref<5x128xf32, #tpu.memory_space<vmem>>, vector<1x128xf32>
      %122 = vector.shape_cast %121 : vector<1x128xf32> to vector<128xf32>
      %123 = vector.shape_cast %122 : vector<128xf32> to vector<1x128xf32>
      %cst_71 = arith.constant dense<0.000000e+00> : vector<1xf32>
      %124 = vector.multi_reduction <add>, %123, %cst_71 [1] : vector<1x128xf32> to vector<1xf32>
      %125 = vector.shape_cast %124 : vector<1xf32> to vector<1x1xf32>
      %126 = vector.extract %125[0, 0] : f32 from vector<1x1xf32>
      %c4_72 = arith.constant 4 : index
      %c0_73 = arith.constant 0 : index
      %127 = vector.load %arg8[%c4_72, %c0_73] : memref<5x128xf32, #tpu.memory_space<vmem>>, vector<1x128xf32>
      %128 = vector.shape_cast %127 : vector<1x128xf32> to vector<128xf32>
      %129 = vector.shape_cast %128 : vector<128xf32> to vector<1x128xf32>
      %cst_74 = arith.constant dense<0.000000e+00> : vector<1xf32>
      %130 = vector.multi_reduction <add>, %129, %cst_74 [1] : vector<1x128xf32> to vector<1xf32>
      %131 = vector.shape_cast %130 : vector<1xf32> to vector<1x1xf32>
      %132 = vector.extract %131[0, 0] : f32 from vector<1x1xf32>
      %133 = arith.divf %108, %114 : f32
      %c0_75 = arith.constant 0 : index
      %134 = memref.load %arg7[%c0_75] : memref<3xf32, #tpu.memory_space<smem>>
      memref.store %133, %arg7[%c0_75] : memref<3xf32, #tpu.memory_space<smem>>
      %cst_76 = arith.constant 2.000000e+00 : f32
      %135 = arith.mulf %cst_76, %120 : f32
      %136 = arith.divf %126, %135 : f32
      %c1_77 = arith.constant 1 : index
      %137 = memref.load %arg7[%c1_77] : memref<3xf32, #tpu.memory_space<smem>>
      memref.store %136, %arg7[%c1_77] : memref<3xf32, #tpu.memory_space<smem>>
      %cst_78 = arith.constant 2.000000e+00 : f32
      %138 = arith.mulf %cst_78, %120 : f32
      %139 = arith.divf %132, %138 : f32
      %c2_79 = arith.constant 2 : index
      %140 = memref.load %arg7[%c2_79] : memref<3xf32, #tpu.memory_space<smem>>
      memref.store %139, %arg7[%c2_79] : memref<3xf32, #tpu.memory_space<smem>>
    } else {
    }
    return
  }
  func.func @transform_0(%arg0: i32) -> (i32, i32, i32) {
    %c0_i32 = arith.constant 0 : i32
    %c0_i32_0 = arith.constant 0 : i32
    %c0_i32_1 = arith.constant 0 : i32
    return %c0_i32, %c0_i32_0, %arg0 : i32, i32, i32
  }
  func.func @transform_1(%arg0: i32) -> (i32, i32, i32) {
    %c0_i32 = arith.constant 0 : i32
    %c0_i32_0 = arith.constant 0 : i32
    %c0_i32_1 = arith.constant 0 : i32
    return %c0_i32, %c0_i32_0, %arg0 : i32, i32, i32
  }
  func.func @transform_2(%arg0: i32) -> (i32, i32, i32) {
    %c0_i32 = arith.constant 0 : i32
    %c0_i32_0 = arith.constant 0 : i32
    %c0_i32_1 = arith.constant 0 : i32
    return %c0_i32, %c0_i32_0, %arg0 : i32, i32, i32
  }
  func.func @transform_3(%arg0: i32) -> (i32, i32, i32) {
    %c0_i32 = arith.constant 0 : i32
    %c0_i32_0 = arith.constant 0 : i32
    %c0_i32_1 = arith.constant 0 : i32
    return %c0_i32, %c0_i32_0, %arg0 : i32, i32, i32
  }
  func.func @transform_4(%arg0: i32) -> (i32, i32, i32) {
    %c0_i32 = arith.constant 0 : i32
    %c0_i32_0 = arith.constant 0 : i32
    %c0_i32_1 = arith.constant 0 : i32
    return %c0_i32, %c0_i32_0, %arg0 : i32, i32, i32
  }
  func.func @transform_5(%arg0: i32) -> (i32, i32, i32) {
    %c0_i32 = arith.constant 0 : i32
    %c0_i32_0 = arith.constant 0 : i32
    %c0_i32_1 = arith.constant 0 : i32
    return %c0_i32, %c0_i32_0, %arg0 : i32, i32, i32
  }
  func.func @transform_6(%arg0: i32) -> i32 {
    %c0_i32 = arith.constant 0 : i32
    %c0_i32_0 = arith.constant 0 : i32
    return %c0_i32 : i32
  }
}

</mosaic_0001>

<bundles_post_ra>
// kernel: tpu_custom_call.1
= control target key start
LH: loop header
LB: loop body
LE: loop exit
PB: predicated region body
PF: predicated region fallthrough
CT: control target
= control target key end

     0   :  { %s1558_s0 = inlined_call_operand.hbm [shape: f32[2,4,256], index: 0, kind: input, shape index: {}]   ;;  %s1559_s1 = inlined_call_operand.hbm [shape: f32[2,4,256], index: 1, kind: input, shape index: {}]   ;;  %s1560_s2 = inlined_call_operand.hbm [shape: f32[2,2,256], index: 2, kind: input, shape index: {}]   ;;  %s1561_s3 = inlined_call_operand.vmem [shape: f32[2,2,256], index: 3, kind: input, shape index: {}]   ;;  %s1562_s4 = inlined_call_operand.hbm [shape: f32[2,2,256], index: 4, kind: input, shape index: {}]   ;;  %s1563_s5 = inlined_call_operand.vmem [shape: f32[2,2,256], index: 5, kind: input, shape index: {}]   ;;  %s1564_s6 = inlined_call_operand.hbm [shape: f32[3], index: 6, kind: output, shape index: {}]  }
   0x1   :  { %1565 = sst [smem:[#allocation18_spill]] %s1559_s1 }
   0x2   :  { %11 = vsyncpa [#allocation4], 0 }
   0x3   :  { %13 = vsyncpa [#allocation4 + $0x1], 0 }
   0x4   :  { %14 = vsyncpa [#allocation7], 0 }
   0x5   :  { %16 = vsyncpa [#allocation7 + $0x1], 0 }
   0x6   :  { %17 = vsyncpa [#allocation11], 0 }
   0x7   :  { %19 = vsyncpa [#allocation11 + $0x1], 0 }
   0x8   :  { %20 = vsyncpa [#allocation5], 0  ;;  %s1209_s21 = smov 0   ;;  %s1211_s22 = smov 0  }
   0x9   :  { %s1213_s23 = smov 0   ;;  %s1215_s24 = smov 0  }
   0xa LB: > { %s1228_s25 = sadd.s32 4294967295, %s1161_s24   ;;  %s1231_s26 = sadd.s32 1, %s1161_s24   ;;  %s1161_s24 = sphi %s1215_s24, %s1578_s24   ;;  %s1157_s23 = sphi %s1213_s23, %s1577_s23   ;;  %s1153_s22 = sphi %s1211_s22, %s1576_s22   ;;  %s1149_s21 = sphi %s1209_s21, %s1575_s21  }
   0xb   : > { %s30_s27 = ssub.s32 %s1161_s24, %s1231_s26  ;;  %s33_s28 = sadd.s32 1, %s1157_s23 }
   0xc   : > { %p31_p0 = scmp.eq.s32.totalorder %s30_s27, 0  ;;  %p40_p1 = scmp.ne.s32.totalorder %s1157_s23, %s1153_s22 }
   0xd   : > { %p41_p2 = scmp.eq.s32.totalorder %s1161_s24, 0  ;;  %p46_p3 = scmp.ne.s32.totalorder %s1153_s22, %s1149_s21 }
   0xe   : > { %s1241_s29 = scalar_select %p31_p0, %s1157_s23, %s33_s28  }
   0xf   : > { %p1243_p4 = por %p41_p2, %p40_p1  ;;  %p47_p5 = scmp.eq.s32.totalorder %s1228_s25, 0 }
  0x10   : > { %p878_p7 = scmp.ge.s32.totalorder %s1161_s24, 2 }
  0x11   : > { %p1248_p6 = por %p47_p5, %p46_p3  ;;  %s1254_s8 = sand.u32 (!%p878_p7), 1, %s1157_s23  }
  0x12   : > { %217 = sbr.rel (%p878_p7) target bundleno = 137 (0x89), region = 16  ;;  %s880_s9 = sshll.u32 (!%p878_p7), %s1161_s24, 6 }
  0x13   : > { %s879_s10 = sshll.u32 (!%p878_p7), %s1254_s8, 3  ;;  %s241_s11 = sand.u32 (!%p878_p7), 1, %s1161_s24  }
  0x14   : > { %s1568_s1 = sld [smem:[#allocation18_spill]] (!%p878_p7)  ;;  %s245_s15 = scalar_lea.vmem (!%p878_p7), [#allocation6], %s879_s10 }
  0x15   : > { %s251_s16 = sshll.u32 (!%p878_p7), %s245_s15, 4  ;;  %s1270_s17 = scalar_lea.sflag (!%p878_p7), [#allocation7], %s241_s11  ;;  %s1268_s16 = int_to_ptr.vmem [resolvable:$true] %s251_s16 }
  0x1a   : > { %s1264_s14 = scalar_lea.hbm %s1568_s1, %s880_s9  ;;  %s995_s21 = scalar_lea.hbm %s1568_s1, 256 }
  0x1b   : > { %s991_s18 = scalar_lea.hbm %s1264_s14, 128  ;;  %p996_p11 = scmp.lt.u32.totalorder %s1264_s14, %s1568_s1 }
  0x1c   : > { %p992_p8 = scmp.ne.s32.totalorder %s1264_s14, %s991_s18  ;;  %p997_p12 = scmp.lt.u32.totalorder %s995_s21, %s991_s18 }
  0x1d   : > { %p999_p0 = scmp.lt.u32.totalorder %s991_s18, %s1264_s14 }
  0x1e   : > { %p993_p9 = pnand %p992_p8, %p1243_p4  ;;  %p998_p13 = por %p997_p12, %p996_p11 }
  0x20   : > { %p994_p10 = pneg %p993_p9  ;;  %p1000_p1 = por %p999_p0, %p998_p13 }
  0x22   : > { %p1001_p2 = pnand %p1000_p1, %p994_p10 }
  0x24   : > { %1004 = shalt.err (!%p1001_p2)
}
  0x25   : > { %s1005_s11 = scalar_lea.vmem %s1268_s16, 128  ;;  %s1163_s12 = smov [#allocation6]  }
  0x26   : > { %p1006_p3 = scmp.ne.s32.totalorder %s1268_s16, %s1005_s11  ;;  %s1009_s13 = sshll.u32 %s1163_s12, 4  ;;  %s1010_s13 = int_to_ptr.vmem [resolvable:$false] %s1009_s13 }
  0x27   : > { %s1011_s15 = scalar_lea.vmem %s1010_s13, 256  ;;  %p1012_p8 = scmp.lt.s32.totalorder %s1268_s16, %s1010_s13 }
  0x28   : > { %p1007_p5 = pnand %p1006_p3, %p1243_p4  ;;  %p1013_p9 = scmp.lt.s32.totalorder %s1011_s15, %s1005_s11 }
  0x2a   : > { %p1008_p7 = pneg %p1007_p5  ;;  %p1014_p11 = por %p1013_p9, %p1012_p8 }
  0x2c   : > { %p1015_p12 = pnand %p1014_p11, %p1008_p7 }
  0x2e   : > { %1018 = shalt.err (!%p1015_p12)
}
  0x2f   : > { %s1164_s18 = smov 128   ;;  %s1165_s19 = smov 64  }
  0x30   : > { %s1166_s20 = smov 4   ;;  %s1302_s28 = scalar_lea.hbm %s1558_s0, %s880_s9 }
  0x31   : > { %923 = dma.hbm_to_vmem [thread:$0]  (%p1243_p4), %s1264_s14, 128, %s1268_s16, %s1270_s17, %s1164_s18, %s1165_s19, %s1166_s20  }
  0x32   : > { %s225_s11 = scalar_lea.vmem [#allocation3], %s879_s10  ;;  %s1309_s13 = sshll.u32 %s1254_s8, 2 }
  0x33   : > { %s231_s12 = sshll.u32 %s225_s11, 4  ;;  %s222_s15 = scalar_lea.sflag [#allocation4], %s1254_s8  ;;  %s1306_s12 = int_to_ptr.vmem [resolvable:$true] %s231_s12 }
  0x34   : > { %s1019_s1 = scalar_lea.hbm %s1302_s28, 128  ;;  %s1023_s16 = scalar_lea.hbm %s1558_s0, 256 }
  0x35   : > { %p1020_p10 = scmp.ne.s32.totalorder %s1302_s28, %s1019_s1  ;;  %p1024_p1 = scmp.lt.u32.totalorder %s1302_s28, %s1558_s0 }
  0x36   : > { %p1025_p2 = scmp.lt.u32.totalorder %s1023_s16, %s1019_s1  ;;  %p1027_p5 = scmp.lt.u32.totalorder %s1019_s1, %s1302_s28 }
  0x37   : > { %p1021_p13 = pnand %p1020_p10, %p1243_p4 }
  0x38   : > { %p1026_p3 = por %p1025_p2, %p1024_p1 }
  0x39   : > { %p1022_p0 = pneg %p1021_p13 }
  0x3a   : > { %p1028_p7 = por %p1027_p5, %p1026_p3 }
  0x3c   : > { %p1029_p8 = pnand %p1028_p7, %p1022_p0 }
  0x3e   : > { %1032 = shalt.err (!%p1029_p8)
}
  0x3f   : > { %s1033_s10 = scalar_lea.vmem %s1306_s12, 128  ;;  %s1167_s11 = smov [#allocation3]  }
  0x40   : > { %p1034_p9 = scmp.ne.s32.totalorder %s1306_s12, %s1033_s10  ;;  %s1037_s14 = sshll.u32 %s1167_s11, 4  ;;  %s1038_s14 = int_to_ptr.vmem [resolvable:$false] %s1037_s14 }
  0x41   : > { %s1039_s9 = scalar_lea.vmem %s1038_s14, 256  ;;  %p1040_p10 = scmp.lt.s32.totalorder %s1306_s12, %s1038_s14 }
  0x42   : > { %p1035_p11 = pnand %p1034_p9, %p1243_p4  ;;  %p1041_p13 = scmp.lt.s32.totalorder %s1039_s9, %s1033_s10 }
  0x44   : > { %p1036_p12 = pneg %p1035_p11  ;;  %p1042_p1 = por %p1041_p13, %p1040_p10 }
  0x46   : > { %p1043_p2 = pnand %p1042_p1, %p1036_p12 }
  0x48   : > { %1046 = shalt.err (!%p1043_p2)
}
  0x49   : > { %922 = dma.hbm_to_vmem [thread:$0]  (%p1243_p4), %s1302_s28, 128, %s1306_s12, %s222_s15, %s1164_s18, %s1165_s19, %s1166_s20  }
  0x4a   : > { %s884_s1 = sshll.u32 %s1161_s24, 5  ;;  %s265_s10 = scalar_lea.vmem [#allocation8], %s1309_s13 }
  0x4b   : > { %s1344_s27 = scalar_lea.hbm %s1560_s2, %s884_s1  ;;  %s271_s11 = sshll.u32 %s265_s10, 4  ;;  %s1347_s11 = int_to_ptr.vmem [resolvable:$true] %s271_s11 }
  0x4c   : > { %s1047_s14 = scalar_lea.hbm %s1344_s27, 64  ;;  %s1051_s28 = scalar_lea.hbm %s1560_s2, 128 }
  0x4d   : > { %p1048_p0 = scmp.ne.s32.totalorder %s1344_s27, %s1047_s14  ;;  %p1052_p7 = scmp.lt.u32.totalorder %s1344_s27, %s1560_s2 }
  0x4e   : > { %p1053_p8 = scmp.lt.u32.totalorder %s1051_s28, %s1047_s14  ;;  %p1055_p11 = scmp.lt.u32.totalorder %s1047_s14, %s1344_s27 }
  0x4f   : > { %p1049_p3 = pnand %p1048_p0, %p1243_p4 }
  0x50   : > { %p1054_p9 = por %p1053_p8, %p1052_p7 }
  0x51   : > { %p1050_p5 = pneg %p1049_p3 }
  0x52   : > { %p1056_p12 = por %p1055_p11, %p1054_p9 }
  0x54   : > { %p1057_p10 = pnand %p1056_p12, %p1050_p5 }
  0x56   : > { %1060 = shalt.err (!%p1057_p10)
}
  0x57   : > { %s1061_s9 = scalar_lea.vmem %s1347_s11, 64  ;;  %s1168_s16 = smov [#allocation8]  }
  0x58   : > { %p1062_p13 = scmp.ne.s32.totalorder %s1347_s11, %s1061_s9  ;;  %s1065_s21 = sshll.u32 %s1168_s16, 4  ;;  %s1066_s21 = int_to_ptr.vmem [resolvable:$false] %s1065_s21 }
  0x59   : > { %s1067_s10 = scalar_lea.vmem %s1066_s21, 128  ;;  %p1068_p0 = scmp.lt.s32.totalorder %s1347_s11, %s1066_s21 }
  0x5a   : > { %p1063_p1 = pnand %p1062_p13, %p1243_p4  ;;  %p1069_p3 = scmp.lt.s32.totalorder %s1067_s10, %s1061_s9 }
  0x5c   : > { %p1064_p2 = pneg %p1063_p1  ;;  %p1070_p7 = por %p1069_p3, %p1068_p0 }
  0x5e   : > { %p1071_p8 = pnand %p1070_p7, %p1064_p2 }
  0x60   : > { %1074 = shalt.err (!%p1071_p8)
}
  0x61   : > { %s1169_s14 = smov 32   ;;  %s1170_s18 = smov 2  }
  0x62   : > { %924 = dma.hbm_to_vmem [thread:$0]  (%p1243_p4), %s1344_s27, 64, %s1347_s11, %s1270_s17, %s1165_s19, %s1169_s14, %s1170_s18  }
  0x63   : > { %280 = sbr.rel (!%p1243_p4) target bundleno = 106 (0x6a), region = 32  ;;  %s886_s20 = sshll.u32 (%p1243_p4), %s1161_s24, 1 }
  0x64   : > { %s286_s15 = scalar_lea.vmem (%p1243_p4), %s1561_s3, %s886_s20  ;;  %s284_s9 = scalar_lea.vmem (%p1243_p4), [#allocation9], %s1309_s13 }
  0x65   : > { %v302_v0 = vld [vmem:[%s286_s15] sm:$0x3] (%p1243_p4)  ;;  %v304_v1 = vld [vmem:[%s286_s15 + $0x4] sm:$0x3] (%p1243_p4) }
  0x66   : > { %303 = vst [vmem:[%s284_s9] sm:$0x3] (%p1243_p4), %v302_v0  ;;  %305 = vst [vmem:[%s284_s9 + $0x2] sm:$0x3] (%p1243_p4), %v304_v1 }
  0x6a PF: > { %s1386_s27 = scalar_lea.hbm %s1562_s4, %s884_s1  ;;  %s329_s11 = scalar_lea.vmem [#allocation10], %s1309_s13 }
  0x6b   : > { %s335_s21 = sshll.u32 %s329_s11, 4  ;;  %s326_s10 = scalar_lea.sflag [#allocation11], %s1254_s8  ;;  %s1389_s21 = int_to_ptr.vmem [resolvable:$true] %s335_s21 }
  0x6c   : > { %s1075_s20 = scalar_lea.hbm %s1386_s27, 64  ;;  %s1079_s15 = scalar_lea.hbm %s1562_s4, 128 }
  0x6d   : > { %p1076_p5 = scmp.ne.s32.totalorder %s1386_s27, %s1075_s20  ;;  %p1080_p12 = scmp.lt.u32.totalorder %s1386_s27, %s1562_s4 }
  0x6e   : > { %p1081_p10 = scmp.lt.u32.totalorder %s1079_s15, %s1075_s20  ;;  %p1083_p1 = scmp.lt.u32.totalorder %s1075_s20, %s1386_s27 }
  0x6f   : > { %p1077_p9 = pnand %p1076_p5, %p1243_p4 }
  0x70   : > { %p1082_p13 = por %p1081_p10, %p1080_p12 }
  0x71   : > { %p1078_p11 = pneg %p1077_p9 }
  0x72   : > { %p1084_p2 = por %p1083_p1, %p1082_p13 }
  0x74   : > { %p1085_p0 = pnand %p1084_p2, %p1078_p11 }
  0x76   : > { %1088 = shalt.err (!%p1085_p0)
}
  0x77   : > { %s1089_s16 = scalar_lea.vmem %s1389_s21, 64  ;;  %s1171_s17 = smov [#allocation10]  }
  0x78   : > { %p1090_p3 = scmp.ne.s32.totalorder %s1389_s21, %s1089_s16  ;;  %s1093_s11 = sshll.u32 %s1171_s17, 4  ;;  %s1094_s11 = int_to_ptr.vmem [resolvable:$false] %s1093_s11 }
  0x79   : > { %s1095_s28 = scalar_lea.vmem %s1094_s11, 128  ;;  %p1096_p5 = scmp.lt.s32.totalorder %s1389_s21, %s1094_s11 }
  0x7a   : > { %p1091_p7 = pnand %p1090_p3, %p1243_p4  ;;  %p1097_p9 = scmp.lt.s32.totalorder %s1095_s28, %s1089_s16 }
  0x7c   : > { %p1092_p8 = pneg %p1091_p7  ;;  %p1098_p12 = por %p1097_p9, %p1096_p5 }
  0x7e   : > { %p1099_p10 = pnand %p1098_p12, %p1092_p8 }
  0x80   : > { %1102 = shalt.err (!%p1099_p10)
}
  0x81   : > { %925 = dma.hbm_to_vmem [thread:$0]  (%p1243_p4), %s1386_s27, 64, %s1389_s21, %s326_s10, %s1165_s19, %s1169_s14, %s1170_s18  }
  0x82   : > { %344 = sbr.rel (!%p1243_p4) target bundleno = 137 (0x89), region = 70  ;;  %s890_s20 = sshll.u32 (%p1243_p4), %s1161_s24, 1 }
  0x83   : > { %s350_s1 = scalar_lea.vmem (%p1243_p4), %s1563_s5, %s890_s20  ;;  %s348_s9 = scalar_lea.vmem (%p1243_p4), [#allocation12], %s1309_s13 }
  0x84   : > { %v366_v2 = vld [vmem:[%s350_s1] sm:$0x3] (%p1243_p4)  ;;  %v368_v3 = vld [vmem:[%s350_s1 + $0x4] sm:$0x3] (%p1243_p4) }
  0x85   : > { %367 = vst [vmem:[%s348_s9] sm:$0x3] (%p1243_p4), %v366_v2  ;;  %369 = vst [vmem:[%s348_s9 + $0x2] sm:$0x3] (%p1243_p4), %v368_v3 }
  0x89 PF: > { %p891_p11 = scmp.ge.s32.totalorder %s1161_s24, 1  ;;  %p387_p13 = scmp.lt.s32.totalorder %s1161_s24, 3 }
  0x8b   : > { %p388_p1 = pnand %p891_p11, %p387_p13 }
  0x8c   : > { %s393_s30 = sand.u32 (!%p388_p1), 1, %s1153_s22  }
  0x8d   : > { %391 = sbr.rel (%p388_p1) target bundleno = 514 (0x202), region = 104  ;;  %s892_s8 = sshll.u32 (!%p388_p1), %s393_s30, 3 }
  0x8e   : > { %s394_s19 = scalar_lea.sflag (!%p388_p1), [#allocation4], %s393_s30  ;;  %s397_s14 = scalar_lea.vmem (!%p388_p1), [#allocation3], %s892_s8 }
  0x94   : > { %1132 = dma.done.wait (%p1248_p6), %s394_s19, 128  }
  0x95   : > { %1134 = vsyncadd (%p1248_p6), %s394_s19, 4294967168  ;;  %s402_s13 = sand.u32 1, %s1228_s25   ;;  %s406_s27 = scalar_lea.vmem [#allocation6], %s892_s8 }
  0x96   : > { %s403_s18 = scalar_lea.sflag [#allocation7], %s402_s13 }
  0x97   : > { %1136 = dma.done.wait (%p1248_p6), %s403_s18, 192  }
  0x98   : > { %1138 = vsyncadd (%p1248_p6), %s403_s18, 4294967104  ;;  %s1437_s24 = sshll.u32 %s393_s30, 2  ;;  %s428_s16 = scalar_lea.sflag [#allocation11], %s393_s30 }
  0x99   : > { %s415_s21 = scalar_lea.vmem [#allocation8], %s1437_s24  ;;  %s423_s10 = scalar_lea.vmem [#allocation9], %s1437_s24 }
  0x9a   : > { %s431_s17 = scalar_lea.vmem [#allocation10], %s1437_s24 }
  0x9b   : > { %1140 = dma.done.wait (%p1248_p6), %s428_s16, 64  }
  0x9c   : > { %1142 = vsyncadd (%p1248_p6), %s428_s16, 4294967232  ;;  %s439_s11 = scalar_lea.vmem [#allocation12], %s1437_s24  ;;  %p898_p4 = scmp.ne.s32.totalorder %s1228_s25, 0 }
  0x9d   : > { %v1172_v4 = vmov (!%p898_p4), 0.0  }
  0x9e   : > { %488 = sbr.rel (%p898_p4) target bundleno = 165 (0xa5), region = 132  ;;  %489 = vst [vmem:[#allocation2] sm:$0x1f] (!%p898_p4), %v1172_v4 }
  0xa5 PF: > { %v1448_v5 = vld [vmem:[%s397_s14] sm:$0xf]  ;;  %v1450_v6 = vld [vmem:[%s397_s14 + $0x4] sm:$0xf]  ;;  %v1452_v7 = vld [vmem:[%s406_s27] sm:$0xf] }
  0xa6   : > { %v1454_v8 = vld [vmem:[%s406_s27 + $0x4] sm:$0xf]  ;;  %v494_v9 = vmul.f32 2.0, %v1452_v7  ;;  %v514_v11 = vand.u32 2147483647, %v1448_v5  ;;  %vm542_vm0 = vcmask 1043456   ;;  %v510_v3 = vmul.f32 %v1452_v7, %v1448_v5 }
  0xa7   : > { %v495_v10 = vmul.f32 2.0, %v1454_v8  ;;  %v515_v12 = vand.u32 2147483647, %v1450_v6  ;;  %v543_v18 = vsel %vm542_vm0, %v1452_v7, -inf  ;;  %v550_v19 = vsel %vm542_vm0, %v1454_v8, -inf  ;;  %p903_p6 = scmp.ne.s32.totalorder %s1228_s25, 1 }
  0xa8   : > { %v496_v13 = vsub.f32 1.0, %v494_v9  ;;  %v516_v15 = vsub.f32 0.0, %v514_v11  ;;  %v557_v20 = vld [vmem:[%s415_s21] sm:$0x3]  ;;  %v558_v21 = vld [vmem:[%s415_s21 + $0x2] sm:$0x3] }
  0xa9   : > { %v497_v14 = vsub.f32 1.0, %v495_v10  ;;  %v517_v16 = vsub.f32 0.0, %v515_v12  ;;  %v544_v25 = vrot.slane %v543_v18, 4  ;;  %v551_v27 = vrot.slane %v550_v19, 4  ;;  %v559_v28 = vld [vmem:[%s423_s10] sm:$0x3] }
  0xaa   : > { %v498_v17 = vmul.f32 %v496_v13, %v1448_v5  ;;  %v518_v23 = vmul.f32 1.442695, %v516_v15  ;;  %v560_v29 = vld [vmem:[%s423_s10 + $0x2] sm:$0x3]  ;;  %v565_v32 = vsub.f32 %v557_v20, %v559_v28  ;;  %vm579_vm1 = vcmask 1041408  }
  0xab   : > { %v499_v22 = vmul.f32 %v497_v14, %v1450_v6  ;;  %v520_v24 = vmul.f32 1.442695, %v517_v16  ;;  %v545_v31 = vmax.f32 %v543_v18, %v544_v25  ;;  %v552_v33 = vmax.f32 %v550_v19, %v551_v27  ;;  %v561_v38 = vld [vmem:[%s431_s17] sm:$0x3]  ;;  %v563_v42 = vld [vmem:[%s439_s11] sm:$0x3] }
  0xac   : > { %v500_v26 = vmul.f32 0.5, %v498_v17  ;;  %975 = vpow2.f32 %v518_v23  ;;  %v566_v34 = vsub.f32 %v558_v21, %v560_v29  ;;  %v567_v36 = vand.u32 2147483647, %v565_v32  ;;  %v562_v46 = vld [vmem:[%s431_s17 + $0x2] sm:$0x3] }
  0xad   : > { %v501_v30 = vmul.f32 0.5, %v499_v22  ;;  %v546_v35 = vrot.slane %v545_v31, 2  ;;  %v571_v37 = vmul.f32 0.5, %v565_v32  ;;  %v553_v39 = vrot.slane %v552_v33, 2  ;;  %v564_v47 = vld [vmem:[%s439_s11 + $0x2] sm:$0x3] }
  0xae   : > { %977 = vtanh.f32 %v500_v26  ;;  %v568_v40 = vand.u32 2147483647, %v566_v34  ;;  %v572_v41 = vmul.f32 0.5, %v566_v34  ;;  %vm569_vm2 = vcmp.lt.f32.partialorder %v567_v36, 1.0  ;;  %v650_v16 = vld [vmem:[#allocation2 + $0x2] sm:$0x1] }
  0xaf   : > { %979 = vtanh.f32 %v501_v30  ;;  %v547_v43 = vmax.f32 %v545_v31, %v546_v35  ;;  %v573_v44 = vmul.f32 %v571_v37, %v565_v32  ;;  %v899_v45 = vadd.f32 -0.5, %v567_v36 }
  0xb0   : > { %981 = vpow2.f32 %v520_v24  ;;  %v554_v48 = vmax.f32 %v552_v33, %v553_v39  ;;  %vm570_vm3 = vcmp.lt.f32.partialorder %v568_v40, 1.0  ;;  %v574_v49 = vmul.f32 %v572_v41, %v566_v34 }
  0xb1   : > { %v900_v50 = vadd.f32 -0.5, %v568_v40  ;;  %v548_v51 = vrot.slane %v547_v43, 1  ;;  %v577_v52 = vsel %vm569_vm2, %v573_v44, %v899_v45  ;;  %v594_v53 = vsub.f32 %v561_v38, %v563_v42 }
  0xb2   : > { %v555_v54 = vrot.slane %v554_v48, 1  ;;  %v580_v56 = vsel %vm579_vm1, %v577_v52, 0.0  ;;  %v595_v57 = vsub.f32 %v562_v46, %v564_v47  ;;  %v508_v1 = vmax.f32 %v1448_v5, 0.0 }
  0xb3   : > { %v578_v55 = vsel %vm570_vm3, %v574_v49, %v900_v50  ;;  %v581_v58 = vrot.slane %v580_v56, 4  ;;  %v596_v60 = vand.u32 2147483647, %v594_v53  ;;  %v1480_v61 = vmax.f32 %v547_v43, %v548_v51 }
  0xb4   : > { %v587_v59 = vsel %vm579_vm1, %v578_v55, 0.0  ;;  %v1482_v62 = vmax.f32 %v554_v48, %v555_v54  ;;  %v509_v2 = vmax.f32 %v1450_v6, 0.0  ;;  %v1490_v10 = vmul.f32 %v1454_v8, %v1450_v6 }
  0xb5   : > { %v588_v63 = vrot.slane %v587_v59, 4  ;;  %v582_v4 = vadd.f32 %v581_v58, %v580_v56  ;;  %v597_v13 = vand.u32 2147483647, %v595_v57  ;;  %vm1494_vm4 = vcmp.lt.f32.partialorder %v596_v60, 1.0 }
  0xb6   : > { %v976_v0 = vpop.eup %975  ;;  %v651_v12 = vadd.f32 %v1482_v62, %v1480_v61  ;;  %v600_v5 = vmul.f32 0.5, %v594_v53  ;;  %v601_v8 = vmul.f32 0.5, %v595_v57  ;;  %v901_v24 = vadd.f32 -0.5, %v596_v60 }
  0xb7   : > { %v522_v11 = vadd.f32 1.0, %v976_v0  ;;  %v583_v17 = vrot.slane %v582_v4, 2  ;;  %v589_v20 = vadd.f32 %v588_v63, %v587_v59  ;;  %v525_v22 = vmul.f32 -0.5, %v976_v0 }
  0xb8   : > { %v978_v9 = vpop.eup %977  ;;  %v528_v26 = vand.u32 2147483647, %v976_v0  ;;  %v653_v27 = vadd.f32 %v651_v12, %v650_v16  ;;  %vm1501_vm5 = vcmp.lt.f32.partialorder %v597_v13, 1.0  ;;  %v602_v35 = vmul.f32 %v600_v5, %v594_v53 }
  0xb9   : > { %v980_v14 = vpop.eup %979  ;;  %v504_v15 = vadd.f32 1.0, %v978_v9  ;;  %983 = vlog2.f32 %v522_v11  ;;  %v584_v28 = vadd.f32 %v583_v17, %v582_v4  ;;  %v590_v34 = vrot.slane %v589_v20, 2 }
  0xba   : > { %v982_v7 = vpop.eup %981  ;;  %v505_v19 = vadd.f32 1.0, %v980_v14  ;;  %654 = vst [vmem:[#allocation2 + $0x2] sm:$0x1] %v653_v27  ;;  %v526_v36 = vadd.f32 1.0, %v525_v22  ;;  %v603_v38 = vmul.f32 %v601_v8, %v595_v57  ;;  %v902_v39 = vadd.f32 -0.5, %v597_v13 }
  0xbb   : > { %v506_v21 = vmul.f32 0.5, %v504_v15  ;;  %v531_v23 = vadd.f32 1.0, %v982_v7  ;;  %v534_v29 = vmul.f32 -0.5, %v982_v7  ;;  %v585_v33 = vrot.slane %v584_v28, 1  ;;  %v655_v14 = vld [vmem:[#allocation2 + $0x3] sm:$0x1] }
  0xbc   : > { %v1498_v25 = vmul.f32 0.5, %v505_v19  ;;  %v512_v40 = vsub.f32 %v508_v1, %v510_v3  ;;  %v591_v42 = vadd.f32 %v590_v34, %v589_v20  ;;  %v606_v43 = vsel %vm1494_vm4, %v602_v35, %v901_v24  ;;  %v637_v24 = vld [vmem:[#allocation2 + $0x1] sm:$0x1] }
  0xbd   : > { %985 = vlog2.f32 %v531_v23  ;;  %v638_v30 = vsel %vm542_vm0, %v506_v21, 0.0  ;;  %v586_v41 = vadd.f32 %v585_v33, %v584_v28  ;;  %v535_v44 = vadd.f32 1.0, %v534_v29 }
  0xbe   : > { %v639_v32 = vsel %vm542_vm0, %v1498_v25, 0.0  ;;  %v607_v46 = vsel %vm1501_vm5, %v603_v38, %v902_v39  ;;  %v608_v47 = vsel %vm579_vm1, %v606_v43, 0.0  ;;  %vm1513_vm6 = vcmp.lt.f32.partialorder %v528_v26, 0.0004427343  ;;  %v622_v43 = vld [vmem:[#allocation2] sm:$0x1] }
  0xbf   : > { %v640_v37 = vadd.f32 %v639_v32, %v638_v30  ;;  %v592_v50 = vrot.slane %v591_v42, 1  ;;  %v609_v51 = vrot.slane %v608_v47, 4  ;;  %v527_v52 = vmul.f32 %v976_v0, %v526_v36  ;;  %v662_v36 = vld [vmem:[#allocation2 + $0x4] sm:$0x1] }
  0xc0   : > { %v537_v53 = vand.u32 2147483647, %v982_v7  ;;  %v656_v54 = vmul.f32 %v586_v41, %v1480_v61  ;;  %v615_v55 = vsel %vm579_vm1, %v607_v46, 0.0  ;;  %v536_v1 = vmul.f32 %v982_v7, %v535_v44 }
  0xc1   : > { %v641_v45 = vsel %vm542_vm0, %v640_v37, 0.0  ;;  %v593_v58 = vadd.f32 %v592_v50, %v591_v42  ;;  %v610_v59 = vadd.f32 %v609_v51, %v608_v47  ;;  %v616_v60 = vrot.slane %v615_v55, 4 }
  0xc2   : > { %v642_v49 = vrot.slane %v641_v45, 4  ;;  %v513_v0 = vsub.f32 %v509_v2, %v1490_v10  ;;  %vm538_vm7 = vcmp.lt.f32.partialorder %v537_v53, 0.0004427343  ;;  %vm674_vm8 = vcmask (!%p903_p6), 1040384  }
  0xc3   : > { %v984_v56 = vpop.eup %983  ;;  %v657_v4 = vmul.f32 %v593_v58, %v1482_v62  ;;  %v611_v9 = vrot.slane %v610_v59, 2  ;;  %v617_v11 = vadd.f32 %v616_v60, %v615_v55 }
  0xc4   : > { %v643_v57 = vadd.f32 %v642_v49, %v641_v45  ;;  %v524_v63 = vmul.f32 0.6931472, %v984_v56 }
  0xc5   : > { %v658_v18 = vadd.f32 %v657_v4, %v656_v54  ;;  %v612_v5 = vadd.f32 %v611_v9, %v610_v59  ;;  %v618_v7 = vrot.slane %v617_v11, 2 }
  0xc6   : > { %v644_v3 = vrot.slane %v643_v57, 2  ;;  %v530_v13 = vsel %vm1513_vm6, %v527_v52, %v524_v63 }
  0xc7   : > { %v986_v12 = vpop.eup %985  ;;  %v540_v16 = vadd.f32 %v530_v13, %v512_v40  ;;  %v660_v22 = vadd.f32 %v658_v18, %v655_v14  ;;  %v613_v26 = vrot.slane %v612_v5, 1  ;;  %v619_v6 = vadd.f32 %v618_v7, %v617_v11 }
  0xc8   : > { %v533_v15 = vmul.f32 0.6931472, %v986_v12  ;;  %v645_v17 = vadd.f32 %v644_v3, %v643_v57 }
  0xc9   : > { %v623_v20 = vmul.f32 %v540_v16, %v506_v21  ;;  %661 = vst [vmem:[#allocation2 + $0x3] sm:$0x1] %v660_v22  ;;  %v614_v28 = vadd.f32 %v613_v26, %v612_v5  ;;  %v620_v29 = vrot.slane %v619_v6, 1 }
  0xca   : > { %v539_v19 = vsel %vm538_vm7, %v536_v1, %v533_v15  ;;  %v646_v8 = vrot.slane %v645_v17, 1 }
  0xcb   : > { %v541_v23 = vadd.f32 %v539_v19, %v513_v0  ;;  %v625_v27 = vsel %vm542_vm0, %v623_v20, 0.0  ;;  %v621_v32 = vadd.f32 %v620_v29, %v619_v6  ;;  %v663_v21 = vmul.f32 %v614_v28, %v1480_v61 }
  0xcc   : > { %v647_v2 = vadd.f32 %v646_v8, %v645_v17 }
  0xcd   : > { %v624_v10 = vmul.f32 %v541_v23, %v1498_v25  ;;  %v664_v34 = vmul.f32 %v621_v32, %v1482_v62  ;;  %v684_v62 = vld [vmem:[#allocation2 + $0x2] sm:$0x1] (!%p903_p6) }
  0xce   : > { %v648_v30 = vadd.f32 %v647_v2, %v637_v24  ;;  %v685_v47 = vsel (!%p903_p6), %vm674_vm8, %v684_v62, 0.0 }
  0xcf   : > { %v626_v31 = vsel %vm542_vm0, %v624_v10, 0.0  ;;  %v665_v38 = vadd.f32 %v664_v34, %v663_v21  ;;  %686 = vadd.xlane.f32.xlu1 (!%p903_p6), %v685_v47 }
  0xd0   : > { %v627_v33 = vadd.f32 %v626_v31, %v625_v27  ;;  %649 = vst [vmem:[#allocation2 + $0x1] sm:$0x1] %v648_v30  ;;  %v689_v49 = vld [vmem:[#allocation2 + $0x3] sm:$0x1] (!%p903_p6) }
  0xd1   : > { %v667_v39 = vadd.f32 %v665_v38, %v662_v36  ;;  %v690_v51 = vsel (!%p903_p6), %vm674_vm8, %v689_v49, 0.0 }
  0xd2   : > { %v628_v35 = vsel %vm542_vm0, %v627_v33, 0.0 }
  0xd3   : > { %v629_v37 = vrot.slane %v628_v35, 4  ;;  %668 = vst [vmem:[#allocation2 + $0x4] sm:$0x1] %v667_v39  ;;  %691 = vadd.xlane.f32.xlu1 (!%p903_p6), %v690_v51 }
  0xd5   : > { %v630_v25 = vadd.f32 %v629_v37, %v628_v35 }
  0xd7   : > { %v631_v40 = vrot.slane %v630_v25, 2  ;;  %v679_v48 = vld [vmem:[#allocation2 + $0x1] sm:$0x1] (!%p903_p6) }
  0xd8   : > { %v680_v50 = vsel (!%p903_p6), %vm674_vm8, %v679_v48, 0.0 }
  0xd9   : > { %v632_v41 = vadd.f32 %v631_v40, %v630_v25 }
  0xda   : > { %v694_v52 = vld [vmem:[#allocation2 + $0x4] sm:$0x1] (!%p903_p6) }
  0xdb   : > { %v633_v42 = vrot.slane %v632_v41, 1  ;;  %672 = sbr.rel (%p903_p6) target bundleno = 499 (0x1f3), region = 136  ;;  %v695_v53 = vsel (!%p903_p6), %vm674_vm8, %v694_v52, 0.0 }
  0xdd   : > { %v634_v44 = vadd.f32 %v633_v42, %v632_v41 }
  0xdf   : > { %v635_v45 = vadd.f32 %v634_v44, %v622_v43 }
  0xe1   : > { %636 = vst [vmem:[#allocation2] sm:$0x1] %v635_v45 }
  0xe8   : > { %v673_v61 = vld [vmem:[#allocation2] sm:$0x1] }
  0xe9   : > { %v675_v46 = vsel %vm674_vm8, %v673_v61, 0.0 }
  0xea   : > { %676 = vadd.xlane.f32.xlu0 %v675_v46 }
  0xee   : > { %681 = vadd.xlane.f32.xlu0 %v680_v50 }
  0xf2   : > { %696 = vadd.xlane.f32.xlu0 %v695_v53 }
 0x15c   : > { %v687_v55 = vpop.xlane.xlu1 %686 }
 0x160   : > { %v692_v57 = vpop.xlane.xlu1 %691 }
 0x177   : > { %v677_v54 = vpop.xlane.xlu0 %676 }
 0x178   : > { %908 = vpush %v677_v54 }
 0x17b   : > { %v682_v56 = vpop.xlane.xlu0 %681 }
 0x17c   : > { %910 = vpush %v682_v56 }
 0x17d   : > { %912 = vpush %v687_v55 }
 0x17e   : > { %914 = vpush %v692_v57 }
 0x17f   : > { %v697_v58 = vpop.xlane.xlu0 %696 }
 0x180   : > { %916 = vpush %v697_v58 }
 0x1a9   : > { %s909_s7 = spop %908 }
 0x1ad   : > { %s911_s28 = spop %910 }
 0x1ae   : > { %v699_v59 = vstv %s911_s28  ;;  %s913_s20 = spop %912 }
 0x1af   : > { %987 = vrcp.f32 %v699_v59  ;;  %s705_s12 = smul.f32 2.0, %s913_s20  ;;  %s915_s15 = spop %914 }
 0x1b1   : > { %v706_v60 = vstv %s705_s12  ;;  %s917_s1 = spop %916 }
 0x1b2   : > { %989 = vrcp.f32 %v706_v60 }
 0x1b9   : > { %v988_v63 = vpop.eup %987 }
 0x1ba   : > { %918 = vpush %v988_v63 }
 0x1bc   : > { %v990_v1 = vpop.eup %989 }
 0x1bd   : > { %920 = vpush %v990_v1 }
 0x1eb   : > { %s919_s9 = spop %918 }
 0x1ec   : > { %s702_s30 = smul.f32 %s919_s9, %s909_s7 }
 0x1ee   : > { %704 = sst [smem:[#allocation13]] %s702_s30  ;;  %s921_s8 = spop %920 }
 0x1ef   : > { %s709_s19 = smul.f32 %s921_s8, %s915_s15 }
 0x1f0   : > { %s715_s14 = smul.f32 %s921_s8, %s917_s1 }
 0x1f1   : > { %711 = sst [smem:[#allocation13 + $0x1]] %s709_s19 }
 0x1f2   : > { %717 = sst [smem:[#allocation13 + $0x2]] %s715_s14 }
 0x1f3 PF: > { %p934_p2 = scmp.eq.s32.totalorder %s1228_s25, 1  ;;  %s1103_s27 = scalar_lea.hbm %s1564_s6, 16 }
 0x1f4   : > { %p1104_p0 = scmp.ne.s32.totalorder %s1564_s6, %s1103_s27  ;;  %p1109_p8 = scmp.lt.u32.totalorder %s1103_s27, %s1564_s6 }
 0x1f6   : > { %p1105_p3 = pnand %p1104_p0, %p934_p2 }
 0x1f8   : > { %p1106_p7 = pneg %p1105_p3 }
 0x1fa   : > { %p1111_p5 = pnand %p1109_p8, %p1106_p7 }
 0x1fc   : > { %1114 = shalt.err (!%p1111_p5)
}
 0x1fd   : > { %s1173_s17 = smov [#allocation13]  }
 0x1fe   : > { %931 = dma.smem_to_hbm (%p934_p2), %s1173_s17, 16, %s1564_s6, [#allocation5]  }
 0x1ff   : > { %1144 = dma.done.wait (%p934_p2), [#allocation5], 16  }
 0x200   : > { %1146 = vsyncadd (%p934_p2), [#allocation5], 4294967280 }
 0x201   : > { %731 = sfence }
 0x202 PF: > { %p23_p9 = scmp.ge.s32.totalorder %s1231_s26, 4   ;;  %s1575_s21 = smov %s1153_s22 }
 0x203   : > { %s1576_s22 = smov %s1157_s23  ;;  %s1577_s23 = smov %s1241_s29 }
 0x204   : > { %s1578_s24 = smov %s1231_s26  ;;  %25 = sbr.rel (!%p23_p9) target bundleno = 10 (0xa), region = 213 }
 0x20b   :  { %737 = vsyncpa [#allocation4], 1 }
 0x20c   :  { %739 = vsyncpa [#allocation4 + $0x1], 1 }
 0x20d   :  { %740 = vsyncpa [#allocation7], 1 }
 0x20e   :  { %742 = vsyncpa [#allocation7 + $0x1], 1 }
 0x20f   :  { %743 = vsyncpa [#allocation11], 1 }
 0x210   :  { %745 = vsyncpa [#allocation11 + $0x1], 1 }
 0x211   :  { %746 = vsyncpa [#allocation5], 1 }
 0x212   :  { %748 = vsyncpa [#allocation5 + $0x1], 1 }

</bundles_post_ra>
